<compile_context>
chip_gen: v7x
topology: tpu7x:2x2x1
jax: 0.10.0
libtpu: 0.0.40
codegen_flags: <defaults>
</compile_context>

<pallas_src>
import jax
import jax.numpy as jnp
from jax.experimental import pallas as pl
from jax.experimental.pallas import tpu as pltpu


def _global_max_pool_kernel(x_ref, o_ref, acc_ref):
    """Grid = (n_feat_tiles [parallel], n_seq_tiles [arbitrary / reduction])."""
    s = pl.program_id(1)
    n_s = pl.num_programs(1)

    x = x_ref[...]                       # (B, ts, tf)
    b, ts, tf = x.shape

    # Per-tile partial max, shape (B, 8, tf).
    # When ts % 8 == 0 the reshape is (8,128)-tile aligned and the reduce over the
    # chunk axis is pure elementwise VPU work (no cross-sublane / XLU traffic).
    if ts % 8 == 0:
        partial = jnp.max(x.reshape(b, ts // 8, 8, tf), axis=1)
    else:
        # Only reachable when the tile is the full, non-multiple-of-8 sequence.
        partial = jnp.broadcast_to(jnp.max(x, axis=1, keepdims=True), (b, 8, tf))

    @pl.when(s == 0)
    def _():
        # First sequence step: overwrite (no -inf/dtype-min sentinel needed).
        acc_ref[...] = partial

    @pl.when(s > 0)
    def _():
        acc_ref[...] = jnp.maximum(acc_ref[...], partial)

    # Single cross-sublane reduce per output block, only on the last step.
    @pl.when(s == n_s - 1)
    def _():
        o_ref[...] = jnp.max(acc_ref[...], axis=1)


def _largest_aligned_divisor(n, limit, align):
    """Largest d with d % align == 0, d | n, d <= limit; None if no such d."""
    best = None
    d = align
    top = min(n, limit)
    while d <= top:
        if n % d == 0:
            best = d
        d += align
    return best


def _pick_feature_tile(F):
    """Lane-dense feature tile: a multiple of 128 dividing F (<= 512), else full F."""
    if F % 128 != 0:
        return F                          # full-extent block dims are always legal
    return _largest_aligned_divisor(F, min(F, 512), 128) or F


def _pick_seq_tile(S, B, tf, itemsize, target_block_bytes):
    # Sublane packing alignment: 8 rows (32-bit), 16 (16-bit), 32 (8-bit).
    align = max(8, 32 // max(1, itemsize))
    target_rows = max(align, target_block_bytes // max(1, B * tf * itemsize))
    if S <= target_rows:
        return S
    d = _largest_aligned_divisor(S, target_rows, align)
    if d is not None:
        return d
    # No aligned divisor of S (e.g. odd S): fall back to the full sequence block.
    # TODO(synk): mask a ragged tail instead of falling back for huge odd S.
    return S


def global_max_pooling_1d(x, *, seq_tile=None, feat_tile=None,
                          target_block_bytes=4 << 20):
    """Max-reduce over axis 1 of a (B, S, F) array == torch.max(x, 1).values."""
    B, S, F = x.shape
    itemsize = jnp.dtype(x.dtype).itemsize

    tf = feat_tile if feat_tile is not None else _pick_feature_tile(F)
    assert tf == F or (F % tf == 0 and tf % 128 == 0), \
        "feat_tile must divide F and be a multiple of 128 (or equal F)"

    ts = seq_tile if seq_tile is not None else _pick_seq_tile(
        S, B, tf, itemsize, target_block_bytes)
    assert ts == S or (S % ts == 0 and ts % 8 == 0), \
        "seq_tile must divide S and be a multiple of 8 (or equal S)"

    n_f = F // tf
    n_s = S // ts

    def in_map(f, s):
        return (0, s, f)

    # Triple-buffer the input stream once there is enough work to pipeline.
    in_spec = None
    if n_f * n_s >= 3 and hasattr(pl, "Buffered"):
        try:
            in_spec = pl.BlockSpec((B, ts, tf), in_map,
                                   pipeline_mode=pl.Buffered(3))
        except TypeError:
            in_spec = None
    if in_spec is None:
        in_spec = pl.BlockSpec((B, ts, tf), in_map)

    return pl.pallas_call(
        _global_max_pool_kernel,
        out_shape=jax.ShapeDtypeStruct((B, F), x.dtype),
        grid_spec=pltpu.PrefetchScalarGridSpec(
            num_scalar_prefetch=0,
            grid=(n_f, n_s),                                 # reduction axis last
            in_specs=[in_spec],
            out_specs=pl.BlockSpec((B, tf), lambda f, s: (0, f)),
            scratch_shapes=[pltpu.VMEM((B, 8, tf), x.dtype)],
        ),
        compiler_params=pltpu.CompilerParams(
            dimension_semantics=("parallel", "arbitrary"),
            vmem_limit_bytes=32 * 1024 * 1024,
        ),
    )(x)


if __name__ == "__main__":
    key = jax.random.PRNGKey(0)

    # Small shape matching the module's forward (B, S, F).
    B, S, F = 2, 8, 32
    x = jax.random.normal(key, (B, S, F), dtype=jnp.float32)
    out = jax.block_until_ready(global_max_pooling_1d(x))
    ref = jnp.max(x, axis=1)
    assert out.shape == (B, F), out.shape
    assert jnp.allclose(out, ref), "mismatch vs reference (small case)"

    # Larger shape that exercises multi-step pipelining, feature tiling,
    # Buffered(3) inputs and the parallel/arbitrary grid.
    B2, S2, F2 = 4, 512, 256
    x2 = jax.random.normal(jax.random.PRNGKey(1), (B2, S2, F2), dtype=jnp.float32)
    out2 = jax.block_until_ready(
        global_max_pooling_1d(x2, seq_tile=64, feat_tile=128))
    assert jnp.allclose(out2, jnp.max(x2, axis=1)), "mismatch vs reference (tiled case)"

    print("KERNEL_OK")
</pallas_src>

<mosaic_0001>
module attributes {stable_mosaic.version = 11 : i64} {
  func.func @_global_max_pool_kernel(%arg0: i32, %arg1: i32, %arg2: memref<2x8x32xf32, #tpu.memory_space<vmem>>, %arg3: memref<2x32xf32, #tpu.memory_space<vmem>>, %arg4: memref<2x8x32xf32, #tpu.memory_space<vmem>>) attributes {dimension_semantics = [#tpu.dimension_semantics<parallel>, #tpu.dimension_semantics<arbitrary>], iteration_bounds = array<i64: 1, 1>, scalar_prefetch = 0 : i64, scratch_operands = 1 : i64, tpu.core_type = #tpu.core_type<tc>, window_params = [{transform_indices = @transform_0, window_bounds = array<i64: 2, 8, 32>}, {transform_indices = @transform_1, window_bounds = array<i64: 2, 32>}]} {
    %c0 = arith.constant 0 : index
    %c0_0 = arith.constant 0 : index
    %c0_1 = arith.constant 0 : index
    %0 = vector.load %arg2[%c0, %c0_0, %c0_1] : memref<2x8x32xf32, #tpu.memory_space<vmem>>, vector<2x8x32xf32>
    %1 = vector.shape_cast %0 : vector<2x8x32xf32> to vector<2x1x8x32xf32>
    %cst = arith.constant dense<0xFF800000> : vector<2x8x32xf32>
    %2 = vector.multi_reduction <maximumf>, %1, %cst [1] : vector<2x1x8x32xf32> to vector<2x8x32xf32>
    %c0_i32 = arith.constant 0 : i32
    %3 = arith.cmpi eq, %arg1, %c0_i32 : i32
    %4 = arith.extui %3 : i1 to i32
    %c0_i32_2 = arith.constant 0 : i32
    %5 = arith.cmpi ne, %4, %c0_i32_2 : i32
    scf.if %5 {
      %c0_7 = arith.constant 0 : index
      %c0_8 = arith.constant 0 : index
      %c0_9 = arith.constant 0 : index
      %12 = vector.load %arg4[%c0_7, %c0_8, %c0_9] : memref<2x8x32xf32, #tpu.memory_space<vmem>>, vector<2x8x32xf32>
      tpu.vector_store %arg4[%c0_7, %c0_8, %c0_9], %2 {strides = array<i32>} : memref<2x8x32xf32, #tpu.memory_space<vmem>>, vector<2x8x32xf32>,
    } else {
    }
    %c0_i32_3 = arith.constant 0 : i32
    %6 = arith.cmpi sgt, %arg1, %c0_i32_3 : i32
    %7 = arith.extui %6 : i1 to i32
    %c0_i32_4 = arith.constant 0 : i32
    %8 = arith.cmpi ne, %7, %c0_i32_4 : i32
    scf.if %8 {
      %c0_7 = arith.constant 0 : index
      %c0_8 = arith.constant 0 : index
      %c0_9 = arith.constant 0 : index
      %12 = vector.load %arg4[%c0_7, %c0_8, %c0_9] : memref<2x8x32xf32, #tpu.memory_space<vmem>>, vector<2x8x32xf32>
      %13 = arith.maximumf %12, %2 : vector<2x8x32xf32>
      %c0_10 = arith.constant 0 : index
      %c0_11 = arith.constant 0 : index
      %c0_12 = arith.constant 0 : index
      %14 = vector.load %arg4[%c0_10, %c0_11, %c0_12] : memref<2x8x32xf32, #tpu.memory_space<vmem>>, vector<2x8x32xf32>
      tpu.vector_store %arg4[%c0_10, %c0_11, %c0_12], %13 {strides = array<i32>} : memref<2x8x32xf32, #tpu.memory_space<vmem>>, vector<2x8x32xf32>,
    } else {
    }
    %c0_i32_5 = arith.constant 0 : i32
    %9 = arith.cmpi eq, %arg1, %c0_i32_5 : i32
    %10 = arith.extui %9 : i1 to i32
    %c0_i32_6 = arith.constant 0 : i32
    %11 = arith.cmpi ne, %10, %c0_i32_6 : i32
    scf.if %11 {
      %c0_7 = arith.constant 0 : index
      %c0_8 = arith.constant 0 : index
      %c0_9 = arith.constant 0 : index
      %12 = vector.load %arg4[%c0_7, %c0_8, %c0_9] : memref<2x8x32xf32, #tpu.memory_space<vmem>>, vector<2x8x32xf32>
      %cst_10 = arith.constant dense<0xFF800000> : vector<2x32xf32>
      %13 = vector.multi_reduction <maximumf>, %12, %cst_10 [1] : vector<2x8x32xf32> to vector<2x32xf32>
      %c0_11 = arith.constant 0 : index
      %c0_12 = arith.constant 0 : index
      %14 = vector.load %arg3[%c0_11, %c0_12] : memref<2x32xf32, #tpu.memory_space<vmem>>, vector<2x32xf32>
      tpu.vector_store %arg3[%c0_11, %c0_12], %13 {strides = array<i32>} : memref<2x32xf32, #tpu.memory_space<vmem>>, vector<2x32xf32>,
    } else {
    }
    return
  }
  func.func @transform_0(%arg0: i32, %arg1: i32) -> (i32, i32, i32) {
    %c0_i32 = arith.constant 0 : i32
    %c0_i32_0 = arith.constant 0 : i32
    return %c0_i32, %arg1, %arg0 : i32, i32, i32
  }
  func.func @transform_1(%arg0: i32, %arg1: i32) -> (i32, i32) {
    %c0_i32 = arith.constant 0 : i32
    %c0_i32_0 = arith.constant 0 : i32
    return %c0_i32, %arg0 : i32, i32
  }
}

</mosaic_0001>

<bundles_post_ra>
// kernel: tpu_custom_call.1
= control target key start
LH: loop header
LB: loop body
LE: loop exit
PB: predicated region body
PF: predicated region fallthrough
CT: control target
= control target key end

     0   :  { %6 = vsyncpa [#allocation4], 0  ;;  %s175_s0 = inlined_call_operand.hbm [shape: f32[2,8,32], index: 0, kind: input, shape index: {}]   ;;  %s176_s1 = inlined_call_operand.hbm [shape: f32[2,32], index: 1, kind: output, shape index: {}]  }
   0x1   :  { %7 = vsyncpa [#allocation5], 0  ;;  %s137_s6 = smov [#allocation3]   ;;  %s89_s10 = scalar_lea.hbm %s175_s0, 256 }
   0x2   :  { %s13_s7 = sshll.u32 %s137_s6, 4  ;;  %p90_p0 = scmp.ne.s32.totalorder %s175_s0, %s89_s10  ;;  %s14_s7 = int_to_ptr.vmem [resolvable:$true] %s13_s7 }
   0x3   :  { %p93_p1 = scmp.lt.u32.totalorder %s89_s10, %s175_s0 }
   0x5   :  { %p95_p2 = pnand %p93_p1, %p90_p0 }
   0x7   :  { %98 = shalt.err (!%p95_p2)
}
   0x8   :  { %s99_s15 = scalar_lea.vmem %s14_s7, 256  ;;  %p104_p4 = scmp.lt.s32.totalorder %s14_s7, %s14_s7 }
   0x9   :  { %p100_p3 = scmp.ne.s32.totalorder %s14_s7, %s99_s15  ;;  %p105_p5 = scmp.lt.s32.totalorder %s99_s15, %s99_s15 }
   0xb   :  { %p106_p6 = por %p105_p5, %p104_p4 }
   0xd   :  { %p107_p7 = pnand %p106_p6, %p100_p3 }
   0xf   :  { %110 = shalt.err (!%p107_p7)
}
  0x10   :  { %s138_s16 = smov 128   ;;  %s139_s17 = smov 8  }
  0x11   :  { %19 = dma.hbm_to_vmem [thread:$0]  %s175_s0, 256, %s14_s7, [#allocation4], %s138_s16, %s138_s16, %s139_s17  }
  0x12   :  { %133 = dma.done.wait [#allocation4], 256  }
  0x13   :  { %134 = vsyncadd [#allocation4], 4294967040  ;;  %vm29_vm0 = vcmask 261120   ;;  %v23_v0 = vld [vmem:[#allocation3] sm:$0xff]  ;;  %v24_v1 = vld [vmem:[#allocation3 + $0x8] sm:$0xff]  ;;  %s140_s0 = smov [#allocation6]  }
  0x14   :  { %30 = vst.msk [vmem:[#allocation2] sm:$0xff] %vm29_vm0, %v23_v0  ;;  %31 = vst.msk [vmem:[#allocation2 + $0x8] sm:$0xff] %vm29_vm0, %v24_v1  ;;  %s76_s20 = sshll.u32 %s140_s0, 4  ;;  %vm65_vm1 = vcmask 1041409   ;;  %vm68_vm2 = vcmask 254976   ;;  %s77_s20 = int_to_ptr.vmem [resolvable:$true] %s76_s20 }
  0x15   :  { %s111_s21 = scalar_lea.vmem %s77_s20, 32  ;;  %p116_p9 = scmp.lt.s32.totalorder %s77_s20, %s77_s20 }
  0x16   :  { %p112_p8 = scmp.ne.s32.totalorder %s77_s20, %s111_s21  ;;  %p117_p10 = scmp.lt.s32.totalorder %s111_s21, %s111_s21 }
  0x18   :  { %p118_p11 = por %p117_p10, %p116_p9 }
  0x1a   :  { %p119_p12 = pnand %p118_p11, %p112_p8 }
  0x1b   :  { %v46_v2 = vld [vmem:[#allocation2] sm:$0xff]  ;;  %v47_v3 = vld [vmem:[#allocation2 + $0x8] sm:$0xff] }
  0x1c   :  { %v49_v4 = vsel %vm29_vm0, %v46_v2, -inf  ;;  %v56_v5 = vsel %vm29_vm0, %v47_v3, -inf }
  0x1d   :  { %v50_v6 = vrot.slane %v49_v4, 4  ;;  %v57_v7 = vrot.slane %v56_v5, 4 }
  0x1f   :  { %v51_v8 = vmax.f32 %v49_v4, %v50_v6  ;;  %v58_v9 = vmax.f32 %v56_v5, %v57_v7 }
  0x21   :  { %v52_v10 = vrot.slane %v51_v8, 2  ;;  %v59_v11 = vrot.slane %v58_v9, 2 }
  0x23   :  { %v53_v12 = vmax.f32 %v51_v8, %v52_v10  ;;  %v60_v13 = vmax.f32 %v58_v9, %v59_v11 }
  0x25   :  { %v54_v14 = vrot.slane %v53_v12, 1  ;;  %v61_v15 = vrot.slane %v60_v13, 1 }
  0x27   :  { %v55_v16 = vmax.f32 %v53_v12, %v54_v14  ;;  %v62_v17 = vmax.f32 %v60_v13, %v61_v15 }
  0x29   :  { %v66_v18 = vsel %vm65_vm1, %v62_v17, %v55_v16 }
  0x2a   :  { %69 = vst.msk [vmem:[#allocation6] sm:$0x3] %vm68_vm2, %v66_v18 }
  0x2b   :  { %122 = shalt.err (!%p119_p12)
}
  0x2c   :  { %s123_s24 = scalar_lea.hbm %s176_s1, 32 }
  0x2d   :  { %p124_p13 = scmp.ne.s32.totalorder %s176_s1, %s123_s24  ;;  %p127_p0 = scmp.lt.u32.totalorder %s123_s24, %s176_s1 }
  0x2f   :  { %p129_p1 = pnand %p127_p0, %p124_p13 }
  0x31   :  { %132 = shalt.err (!%p129_p1)
}
  0x32   :  { %79 = dma.vmem_to_hbm [thread:$0]  %s77_s20, 32, %s176_s1, [#allocation5]  }
  0x33   :  { %135 = dma.done.wait [#allocation5], 32  }
  0x34   :  { %136 = vsyncadd [#allocation5], 4294967264 }
  0x35   :  { %83 = vsyncpa [#allocation4], 1 }
  0x36   :  { %84 = vsyncpa [#allocation5], 1 }

</bundles_post_ra>
